<compile_context>
chip_gen: v7x
topology: tpu7x:2x2x1
jax: 0.10.0
libtpu: 0.0.40
codegen_flags: <defaults>
</compile_context>

<pallas_src>
import functools

import jax
import jax.numpy as jnp
from jax.experimental import pallas as pl
from jax.experimental.pallas import tpu as pltpu


def rnn_cell_kernel(x_ref, h_ref, w_ref, b_ref, y_ref, *,
                    input_size: int, hidden_size: int):
    x = x_ref[...]                       # (B, I)
    h = h_ref[...]                       # (B, H)

    # Fused projection: y = [hidden | logits] = x @ W[:I] + h @ W[I:] + b
    # (I is a multiple of 8, so the weight slices are sublane-aligned.)
    y = (jnp.dot(x, w_ref[:input_size, :], preferred_element_type=jnp.float32)
         + jnp.dot(h, w_ref[input_size:, :], preferred_element_type=jnp.float32)
         + b_ref[...])                   # (B, H+O) f32

    # Masked log-softmax over the logit columns (col >= H); hidden columns pass
    # through untouched.  Avoids lane slicing / concat and keeps one dense store.
    col = jax.lax.broadcasted_iota(jnp.int32, y.shape, 1)
    is_logit = col >= hidden_size
    neg_big = jnp.finfo(jnp.float32).min

    m = jnp.max(jnp.where(is_logit, y, neg_big), axis=1, keepdims=True)
    shifted = y - m
    sumexp = jnp.sum(jnp.exp(jnp.where(is_logit, shifted, neg_big)),
                     axis=1, keepdims=True)
    lse = jnp.log(sumexp)

    y_ref[...] = jnp.where(is_logit, shifted - lse, y).astype(y_ref.dtype)


def rnn_forward(vec_input, vec_hidden, w_i2h, b_i2h, w_i2o, b_i2o):
    """Pallas implementation of RNN.forward.

    vec_input: (B, I), vec_hidden: (B, H)
    w_i2h: (I+H, H), b_i2h: (H,), w_i2o: (I+H, O), b_i2o: (O,)
    returns (log_softmax_output (B, O), new_hidden (B, H))
    """
    B, I = vec_input.shape
    H = w_i2h.shape[1]
    O = w_i2o.shape[1]

    # One-time weight/bias fusion along the output axis (done outside the
    # kernel; in a real model these would simply be stored fused).
    w_fused = jnp.concatenate([w_i2h, w_i2o], axis=1)            # (I+H, H+O)
    b_fused = jnp.concatenate([b_i2h, b_i2o]).reshape(1, H + O)  # (1, H+O)

    y = pl.pallas_call(
        functools.partial(rnn_cell_kernel, input_size=I, hidden_size=H),
        out_shape=jax.ShapeDtypeStruct((B, H + O), vec_input.dtype),
        in_specs=[
            pl.BlockSpec(memory_space=pltpu.VMEM),   # vec_input
            pl.BlockSpec(memory_space=pltpu.VMEM),   # vec_hidden
            pl.BlockSpec(memory_space=pltpu.VMEM),   # fused weight
            pl.BlockSpec(memory_space=pltpu.VMEM),   # fused bias
        ],
        out_specs=pl.BlockSpec(memory_space=pltpu.VMEM),
    )(vec_input, vec_hidden, w_fused, b_fused)

    hidden = y[:, :H]
    output = y[:, H:]
    return output, hidden


if __name__ == "__main__":
    # Small shapes consistent with the module's forward pass.
    B = 2            # batch
    INPUT = 16       # input_size
    HIDDEN = 32      # hidden_size
    OUTPUT = 8       # output_size

    key = jax.random.PRNGKey(0)
    k1, k2, k3, k4, k5, _ = jax.random.split(key, 6)

    # Deterministic parameter init (uniform, roughly like PyTorch Linear default).
    bound = 1.0 / jnp.sqrt(INPUT + HIDDEN)
    w_i2h = jax.random.uniform(k1, (INPUT + HIDDEN, HIDDEN),
                               minval=-bound, maxval=bound, dtype=jnp.float32)
    b_i2h = jax.random.uniform(k2, (HIDDEN,),
                               minval=-bound, maxval=bound, dtype=jnp.float32)
    w_i2o = jax.random.uniform(k3, (INPUT + HIDDEN, OUTPUT),
                               minval=-bound, maxval=bound, dtype=jnp.float32)
    b_i2o = jax.random.uniform(k4, (OUTPUT,),
                               minval=-bound, maxval=bound, dtype=jnp.float32)

    vec_input = jax.random.normal(k5, (B, INPUT), dtype=jnp.float32)
    vec_hidden = jnp.zeros((B, HIDDEN), dtype=jnp.float32)   # initHidden(), broadcast over B

    out, hid = rnn_forward(vec_input, vec_hidden, w_i2h, b_i2h, w_i2o, b_i2o)
    jax.block_until_ready((out, hid))

    # Reference check in plain JAX (matches the PyTorch forward).
    combined = jnp.concatenate([vec_input, vec_hidden], axis=1)
    hid_ref = combined @ w_i2h + b_i2h
    logits_ref = combined @ w_i2o + b_i2o
    out_ref = jax.nn.log_softmax(logits_ref, axis=1)
    assert jnp.allclose(out, out_ref, atol=1e-5), "output mismatch"
    assert jnp.allclose(hid, hid_ref, atol=1e-5), "hidden mismatch"

    print("KERNEL_OK")
</pallas_src>

<mosaic_0001>
module attributes {stable_mosaic.version = 11 : i64} {
  func.func @rnn_cell_kernel(%arg0: memref<2x16xf32, #tpu.memory_space<vmem>>, %arg1: memref<2x32xf32, #tpu.memory_space<vmem>>, %arg2: memref<48x40xf32, #tpu.memory_space<vmem>>, %arg3: memref<1x40xf32, #tpu.memory_space<vmem>>, %arg4: memref<2x40xf32, #tpu.memory_space<vmem>>) attributes {dimension_semantics = [], scalar_prefetch = 0 : i64, scratch_operands = 0 : i64, tpu.core_type = #tpu.core_type<tc>} {
    %c0 = arith.constant 0 : index
    %c0_0 = arith.constant 0 : index
    %0 = vector.load %arg0[%c0, %c0_0] : memref<2x16xf32, #tpu.memory_space<vmem>>, vector<2x16xf32>
    %c0_1 = arith.constant 0 : index
    %c0_2 = arith.constant 0 : index
    %1 = vector.load %arg1[%c0_1, %c0_2] : memref<2x32xf32, #tpu.memory_space<vmem>>, vector<2x32xf32>
    %c0_3 = arith.constant 0 : index
    %c0_4 = arith.constant 0 : index
    %2 = vector.load %arg2[%c0_3, %c0_4] : memref<48x40xf32, #tpu.memory_space<vmem>>, vector<16x40xf32>
    %cst = arith.constant dense<0.000000e+00> : vector<2x40xf32>
    %3 = tpu.matmul %0, %2, %cst {dimension_numbers = #tpu.dot_dimension_numbers<[1], [0], [0], [1], [0, 0, 1, 1], [], []>} : vector<2x16xf32>, vector<16x40xf32>, vector<2x40xf32> -> vector<2x40xf32>
    %c16 = arith.constant 16 : index
    %c0_5 = arith.constant 0 : index
    %4 = vector.load %arg2[%c16, %c0_5] : memref<48x40xf32, #tpu.memory_space<vmem>>, vector<32x40xf32>
    %cst_6 = arith.constant dense<0.000000e+00> : vector<2x40xf32>
    %5 = tpu.matmul %1, %4, %cst_6 {dimension_numbers = #tpu.dot_dimension_numbers<[1], [0], [0], [1], [0, 0, 1, 1], [], []>} : vector<2x32xf32>, vector<32x40xf32>, vector<2x40xf32> -> vector<2x40xf32>
    %6 = arith.addf %3, %5 : vector<2x40xf32>
    %c0_7 = arith.constant 0 : index
    %c0_8 = arith.constant 0 : index
    %7 = vector.load %arg3[%c0_7, %c0_8] : memref<1x40xf32, #tpu.memory_space<vmem>>, vector<1x40xf32>
    %8 = vector.broadcast %7 : vector<1x40xf32> to vector<2x40xf32>
    %9 = arith.addf %6, %8 : vector<2x40xf32>
    %10 = tpu.iota {dimensions = array<i32: 1>} : vector<2x40xi32>
    %c32_i32 = arith.constant 32 : i32
    %11 = vector.broadcast %c32_i32 : i32 to vector<2x40xi32>
    %12 = arith.cmpi sge, %10, %11 : vector<2x40xi32>
    %cst_9 = arith.constant -3.40282347E+38 : f32
    %13 = vector.broadcast %cst_9 : f32 to vector<2x40xf32>
    %14 = arith.select %12, %9, %13 : vector<2x40xi1>, vector<2x40xf32>
    %cst_10 = arith.constant dense<0xFF800000> : vector<2xf32>
    %15 = vector.multi_reduction <maximumf>, %14, %cst_10 [1] : vector<2x40xf32> to vector<2xf32>
    %16 = vector.shape_cast %15 : vector<2xf32> to vector<2x1xf32>
    %17 = vector.broadcast %16 : vector<2x1xf32> to vector<2x40xf32>
    %18 = arith.subf %9, %17 : vector<2x40xf32>
    %cst_11 = arith.constant -3.40282347E+38 : f32
    %19 = vector.broadcast %cst_11 : f32 to vector<2x40xf32>
    %20 = arith.select %12, %18, %19 : vector<2x40xi1>, vector<2x40xf32>
    %21 = math.exp %20 : vector<2x40xf32>
    %cst_12 = arith.constant dense<0.000000e+00> : vector<2xf32>
    %22 = vector.multi_reduction <add>, %21, %cst_12 [1] : vector<2x40xf32> to vector<2xf32>
    %23 = vector.shape_cast %22 : vector<2xf32> to vector<2x1xf32>
    %24 = math.log %23 : vector<2x1xf32>
    %25 = vector.broadcast %24 : vector<2x1xf32> to vector<2x40xf32>
    %26 = arith.subf %18, %25 : vector<2x40xf32>
    %27 = arith.select %12, %26, %9 : vector<2x40xi1>, vector<2x40xf32>
    %c0_13 = arith.constant 0 : index
    %c0_14 = arith.constant 0 : index
    %28 = vector.load %arg4[%c0_13, %c0_14] : memref<2x40xf32, #tpu.memory_space<vmem>>, vector<2x40xf32>
    tpu.vector_store %arg4[%c0_13, %c0_14], %27 {strides = array<i32>} : memref<2x40xf32, #tpu.memory_space<vmem>>, vector<2x40xf32>,
    return
  }
}

</mosaic_0001>

<bundles_post_ra>
// kernel: tpu_custom_call.1
= control target key start
LH: loop header
LB: loop body
LE: loop exit
PB: predicated region body
PF: predicated region fallthrough
CT: control target
= control target key end

     0   :  { %v286_v3 = vmov 0.0|0.0   ;;  %vm287_vm0 = vmmov 0   ;;  %v288_v9 = vmov 0.0   ;;  %s360_s0 = inlined_call_operand.vmem [shape: f32[2,16], index: 0, kind: input, shape index: {}]   ;;  %s361_s1 = inlined_call_operand.vmem [shape: f32[2,32], index: 1, kind: input, shape index: {}]   ;;  %s362_s2 = inlined_call_operand.vmem [shape: f32[48,40], index: 2, kind: input, shape index: {}]   ;;  %s363_s3 = inlined_call_operand.vmem [shape: f32[1,40], index: 3, kind: input, shape index: {}]   ;;  %s364_s4 = inlined_call_operand.hbm [shape: f32[2,40], index: 4, kind: output, shape index: {}]  }
   0x1   :  { %v22_v0 = vld [vmem:[%s362_s2 + $0x10] sm:$0xff]  ;;  %v23_v1 = vld [vmem:[%s362_s2 + $0x18] sm:$0xff]  ;;  %v20_v2 = vld [vmem:[%s362_s2] sm:$0xff]  ;;  %245 = vmatprep.subr.bf16.mxu0 %v286_v3  ;;  %251 = vmatprep.subr.bf16.mxu1 %v286_v3 }
   0x2   :  { %v246_v4 = vpack.c.bf16 %v23_v1, %v22_v0  ;;  %v21_v5 = vld [vmem:[%s362_s2 + $0x8] sm:$0xff]  ;;  %v24_v6 = vld [vmem:[%s362_s2 + $0x20] sm:$0xff]  ;;  %242 = vmatprep.mubr.msk.f32.mxu1 %vm287_vm0, %v288_v9  ;;  %235 = vmatprep.mubr.msk.f32.mxu0 %vm287_vm0, %v288_v9 }
   0x3   :  { %v25_v7 = vld [vmem:[%s362_s2 + $0x28] sm:$0xff]  ;;  %v252_v8 = vpack.c.bf16 %v21_v5, %v20_v2 }
   0x4   :  { %9 = vsyncpa [#allocation3], 0  ;;  %247 = vmatpush3.bf16.msra.mxu0 %v246_v4  ;;  %v249_v10 = vpack.c.bf16 %v25_v7, %v24_v6  ;;  %v18_v11 = vld [vmem:[%s360_s0] sm:$0x3]  ;;  %vm100_vm1 = vcmask 130048   ;;  %vm26_vm2 = vcmask 261120   ;;  %v182_v13 = vlaneseq }
   0x5   :  { %248 = vmatprep.subr.bf16.mxu0 %v286_v3  ;;  %253 = vmatpush3.bf16.msra.mxu1 %v252_v8  ;;  %v19_v12 = vld [vmem:[%s361_s1] sm:$0x3]  ;;  %vm186_vm4 = vcmask 320512   ;;  %s289_s0 = smov [#allocation2]  }
   0x6   :  { %v183_v16 = vand.u32 127, %v182_v13  ;;  %v218_v18 = vld [vmem:[%s363_s3] ss:$0 sm:$0xff]  ;;  %s208_s1 = sshll.u32 %s289_s0, 4  ;;  %s209_s1 = int_to_ptr.vmem [resolvable:$true] %s208_s1 }
   0x7   :  { %s262_s3 = scalar_lea.vmem %s209_s1, 32  ;;  %p267_p1 = scmp.lt.s32.totalorder %s209_s1, %s209_s1 }
   0x8   :  { %250 = vmatpush3.bf16.msra.mxu0 %v249_v10  ;;  %243 = vmatmul.mubr.msk.f32.vlgmr.msra.gmra.mrb[0].mxu1 %vm100_vm1, %v18_v11  ;;  %vm184_vm3 = vcmp.ge.s32.totalorder %v183_v16, 32  ;;  %p263_p0 = scmp.ne.s32.totalorder %s209_s1, %s262_s3  ;;  %p268_p2 = scmp.lt.s32.totalorder %s262_s3, %s262_s3 }
   0xa   :  { %p269_p3 = por %p268_p2, %p267_p1 }
   0xb   :  { %236 = vmatmul.mubr.msk.f32.vlgmr.msra.gmra.mrb[0].mxu0 %vm26_vm2, %v19_v12 }
   0xc   :  { %p270_p4 = pnand %p269_p3, %p263_p0 }
  0xdb   :  { %v170_v14 = vpop.f32.mrb[0].mxu1 }
  0xdc   :  { %v244_v15 = vpop.f32.mrb[1].mxu1 }
  0xde   :  { %v96_v17 = vpop.f32.mrb[0].mxu0 }
  0xdf   :  { %v171_v19 = vadd.f32 %v170_v14, %v96_v17  ;;  %v237_v20 = vpop.f32.mrb[1].mxu0 }
  0xe1   :  { %v181_v21 = vadd.f32 %v218_v18, %v171_v19 }
  0xe3   :  { %v185_v22 = vsel %vm184_vm3, %v181_v21, -3.4028235e+38 }
  0xe4   :  { %v187_v23 = vsel %vm186_vm4, %v185_v22, -inf }
  0xe5   :  { %188 = vmax.xlane.f32.xlu0 %v187_v23 }
 0x172   :  { %v189_v24 = vpop.xlane.xlu0 %188 }
 0x173   :  { %v190_v25 = vsub.f32 %v181_v21, %v189_v24 }
 0x175   :  { %v191_v26 = vsel %vm184_vm3, %v190_v25, -3.4028235e+38 }
 0x176   :  { %v192_v27 = vmul.f32 1.442695, %v191_v26 }
 0x178   :  { %258 = vpow2.f32 %v192_v27 }
 0x182   :  { %v259_v28 = vpop.eup %258 }
 0x183   :  { %v194_v29 = vsel %vm186_vm4, %v259_v28, 0.0 }
 0x184   :  { %195 = vadd.xlane.f32.xlu0 %v194_v29 }
 0x211   :  { %v196_v30 = vpop.xlane.xlu0 %195 }
 0x212   :  { %260 = vlog2.f32 %v196_v30 }
 0x21c   :  { %v261_v31 = vpop.eup %260 }
 0x21d   :  { %v198_v32 = vmul.f32 0.6931472, %v261_v31 }
 0x21f   :  { %v199_v33 = vsub.f32 %v190_v25, %v198_v32 }
 0x221   :  { %v200_v34 = vsel %vm184_vm3, %v199_v33, %v181_v21 }
 0x222   :  { %201 = vst.msk [vmem:[#allocation2] sm:$0x3] %vm186_vm4, %v200_v34 }
 0x223   :  { %273 = shalt.err (!%p270_p4)
}
 0x224   :  { %s274_s8 = scalar_lea.hbm %s364_s4, 32 }
 0x225   :  { %p275_p5 = scmp.ne.s32.totalorder %s364_s4, %s274_s8  ;;  %p278_p6 = scmp.lt.u32.totalorder %s274_s8, %s364_s4 }
 0x227   :  { %p280_p7 = pnand %p278_p6, %p275_p5 }
 0x229   :  { %283 = shalt.err (!%p280_p7)
}
 0x22a   :  { %211 = dma.vmem_to_hbm [thread:$0]  %s209_s1, 32, %s364_s4, [#allocation3]  }
 0x22b   :  { %284 = dma.done.wait [#allocation3], 32  }
 0x22c   :  { %285 = vsyncadd [#allocation3], 4294967264 }
 0x22d   :  { %215 = vsyncpa [#allocation3], 1 }

</bundles_post_ra>
